<compile_context>
chip_gen: v7x
topology: tpu7x:2x2x1
jax: 0.10.0
libtpu: 0.0.40
codegen_flags: <defaults>
</compile_context>

<pallas_src>
import functools

import numpy as np
import jax
import jax.numpy as jnp
from jax.experimental import pallas as pl
from jax.experimental.pallas import tpu as pltpu


def edge_block_kernel(recv_ref, send_ref, egid_ref, edges_ref,
                      w_edge_ref, table_ref, out_ref, *, gather_dtype):
    tE = edges_ref.shape[0]
    K = table_ref.shape[0]                       # 2*N + G rows in the fused table

    # Combined one-hot: row e has ones at columns recv[e], N+send[e], 2N+egid[e]
    # (offsets are pre-added in the wrapper, so the three hit-ranges are
    # disjoint).  Built directly against a broadcasted_iota; computed once per
    # grid step.
    lane = jax.lax.broadcasted_iota(jnp.int32, (tE, K), 1)
    hit = ((lane == recv_ref[...]) |
           (lane == send_ref[...]) |
           (lane == egid_ref[...]))
    onehot = hit.astype(gather_dtype)

    # Two MXU pushes per tile:
    #   (1) dense edge features @ W_edge
    #   (2) fused gather/broadcast of pre-projected node & global contributions
    acc = jnp.dot(edges_ref[...].astype(gather_dtype), w_edge_ref[...],
                  preferred_element_type=jnp.float32)
    acc = acc + jnp.dot(onehot, table_ref[...],
                        preferred_element_type=jnp.float32)
    out_ref[...] = acc.astype(out_ref.dtype)


def edge_block_forward(edges, receivers, senders, nodes, globals_, n_edge,
                       w_e, w_r, w_s, w_g, b, *,
                       tile_e=128, gather_dtype=jnp.float32):
    """EdgeBlock forward; returns updated edge features of shape (E, Dout)."""
    E, De = edges.shape
    N, Dn = nodes.shape
    G, Dg = globals_.shape
    Dout = w_e.shape[1]
    hi = jax.lax.Precision.HIGHEST

    # ---- lane-dense output: pad Dout up to a multiple of 128 ----------------
    d_pad = pl.cdiv(Dout, 128) * 128
    pc = d_pad - Dout

    # ---- tiny O(N+G) pre-projections (exact algebraic refactoring) ----------
    #   nodes[recv] @ w_r == onehot_recv @ (nodes @ w_r), etc.; bias folded
    #   into the per-graph globals row (each edge hits exactly one graph row).
    p_recv = jnp.dot(nodes, w_r, precision=hi)                  # (N, Dout)
    p_send = jnp.dot(nodes, w_s, precision=hi)                  # (N, Dout)
    p_glob = jnp.dot(globals_, w_g, precision=hi) + b           # (G, Dout)
    table = jnp.concatenate([p_recv, p_send, p_glob], axis=0)   # (2N+G, Dout)
    table = jnp.pad(table, ((0, 0), (0, pc))).astype(gather_dtype)
    w_edge = jnp.pad(w_e, ((0, 0), (0, pc))).astype(gather_dtype)

    # ---- per-edge graph ids (== repeat_interleave(globals, n_edge)) ---------
    egid = jnp.repeat(jnp.arange(G, dtype=jnp.int32), n_edge,
                      total_repeat_length=E)

    # ---- pad the edge dimension to a multiple of tile_e ----------------------
    e_pad = pl.cdiv(E, tile_e) * tile_e
    pe = e_pad - E
    edges_p = jnp.pad(edges, ((0, pe), (0, 0)))
    recv_p = jnp.pad(receivers.astype(jnp.int32), (0, pe)).reshape(e_pad, 1)
    send_p = (jnp.pad(senders.astype(jnp.int32), (0, pe)) + N).reshape(e_pad, 1)
    egid_p = (jnp.pad(egid, (0, pe)) + 2 * N).reshape(e_pad, 1)

    kernel = functools.partial(edge_block_kernel, gather_dtype=gather_dtype)

    out = pl.pallas_call(
        kernel,
        out_shape=jax.ShapeDtypeStruct((e_pad, d_pad), jnp.float32),
        grid=(e_pad // tile_e,),
        in_specs=[
            pl.BlockSpec((tile_e, 1), lambda i: (i, 0)),          # receivers
            pl.BlockSpec((tile_e, 1), lambda i: (i, 0)),          # senders (+N)
            pl.BlockSpec((tile_e, 1), lambda i: (i, 0)),          # edge graph id (+2N)
            pl.BlockSpec((tile_e, De), lambda i: (i, 0)),         # edge features
            pl.BlockSpec((De, d_pad), lambda i: (0, 0)),          # W_edge (resident)
            pl.BlockSpec((2 * N + G, d_pad), lambda i: (0, 0)),   # fused table (resident)
        ],
        out_specs=pl.BlockSpec((tile_e, d_pad), lambda i: (i, 0)),
        compiler_params=pltpu.CompilerParams(
            dimension_semantics=("parallel",)),
    )(recv_p, send_p, egid_p, edges_p, w_edge, table)

    return out[:E, :Dout]


def reference_forward(edges, receivers, senders, nodes, globals_, n_edge,
                      w_e, w_r, w_s, w_g, b):
    """Pure-JAX reference matching the PyTorch EdgeBlock semantics."""
    E = edges.shape[0]
    G = globals_.shape[0]
    egid = jnp.repeat(jnp.arange(G, dtype=jnp.int32), n_edge,
                      total_repeat_length=E)
    collected = jnp.concatenate(
        [edges, nodes[receivers], nodes[senders], globals_[egid]], axis=-1)
    w_full = jnp.concatenate([w_e, w_r, w_s, w_g], axis=0)
    return jnp.dot(collected, w_full, precision=jax.lax.Precision.HIGHEST) + b


if __name__ == "__main__":
    # Small synthetic GraphsTuple: 2 graphs, 16 nodes, 200 edges (pads to 2
    # grid steps of 128 edges each).
    n_graphs = 2
    N = 16
    De, Dn, Dg, Dout = 8, 8, 4, 32
    n_edge = np.array([120, 80], dtype=np.int32)     # per-graph edge counts
    E = int(n_edge.sum())                            # 200 edges

    key = jax.random.PRNGKey(0)
    ks = jax.random.split(key, 10)

    edges = jax.random.normal(ks[0], (E, De), dtype=jnp.float32)
    nodes = jax.random.normal(ks[1], (N, Dn), dtype=jnp.float32)
    globals_ = jax.random.normal(ks[2], (n_graphs, Dg), dtype=jnp.float32)
    receivers = jax.random.randint(ks[3], (E,), 0, N, dtype=jnp.int32)
    senders = jax.random.randint(ks[4], (E,), 0, N, dtype=jnp.int32)

    # Edge model (Linear) parameters, split along the concat axis:
    # in_dim = De + Dn + Dn + Dg (edges | recv nodes | send nodes | globals).
    scale = 1.0 / np.sqrt(De + 2 * Dn + Dg)
    w_e = jax.random.normal(ks[5], (De, Dout), dtype=jnp.float32) * scale
    w_r = jax.random.normal(ks[6], (Dn, Dout), dtype=jnp.float32) * scale
    w_s = jax.random.normal(ks[7], (Dn, Dout), dtype=jnp.float32) * scale
    w_g = jax.random.normal(ks[8], (Dg, Dout), dtype=jnp.float32) * scale
    b = jax.random.normal(ks[9], (Dout,), dtype=jnp.float32) * 0.01

    out = edge_block_forward(edges, receivers, senders, nodes, globals_,
                             jnp.asarray(n_edge), w_e, w_r, w_s, w_g, b,
                             tile_e=128)
    out = jax.block_until_ready(out)

    ref = reference_forward(edges, receivers, senders, nodes, globals_,
                            jnp.asarray(n_edge), w_e, w_r, w_s, w_g, b)
    np.testing.assert_allclose(np.asarray(out), np.asarray(ref),
                               rtol=5e-5, atol=5e-5)
    print("KERNEL_OK")
</pallas_src>

<mosaic_0001>
module attributes {stable_mosaic.version = 11 : i64} {
  func.func @edge_block_kernel(%arg0: i32, %arg1: memref<128x1xi32, #tpu.memory_space<vmem>>, %arg2: memref<128x1xi32, #tpu.memory_space<vmem>>, %arg3: memref<128x1xi32, #tpu.memory_space<vmem>>, %arg4: memref<128x8xf32, #tpu.memory_space<vmem>>, %arg5: memref<8x128xf32, #tpu.memory_space<vmem>>, %arg6: memref<34x128xf32, #tpu.memory_space<vmem>>, %arg7: memref<128x128xf32, #tpu.memory_space<vmem>>) attributes {dimension_semantics = [#tpu.dimension_semantics<parallel>], iteration_bounds = array<i64: 2>, scalar_prefetch = 0 : i64, scratch_operands = 0 : i64, tpu.core_type = #tpu.core_type<tc>, window_params = [{transform_indices = @transform_0, window_bounds = array<i64: 128, 1>}, {transform_indices = @transform_1, window_bounds = array<i64: 128, 1>}, {transform_indices = @transform_2, window_bounds = array<i64: 128, 1>}, {transform_indices = @transform_3, window_bounds = array<i64: 128, 8>}, {pipeline_mode = #tpu.pipeline_mode<synchronous>, transform_indices = @transform_4, window_bounds = array<i64: 8, 128>}, {pipeline_mode = #tpu.pipeline_mode<synchronous>, transform_indices = @transform_5, window_bounds = array<i64: 34, 128>}, {transform_indices = @transform_6, window_bounds = array<i64: 128, 128>}]} {
    %0 = tpu.iota {dimensions = array<i32: 1>} : vector<128x34xi32>
    %c0 = arith.constant 0 : index
    %c0_0 = arith.constant 0 : index
    %1 = vector.load %arg1[%c0, %c0_0] : memref<128x1xi32, #tpu.memory_space<vmem>>, vector<128x1xi32>
    %2 = vector.broadcast %1 : vector<128x1xi32> to vector<128x34xi32>
    %3 = arith.cmpi eq, %0, %2 : vector<128x34xi32>
    %c0_1 = arith.constant 0 : index
    %c0_2 = arith.constant 0 : index
    %4 = vector.load %arg2[%c0_1, %c0_2] : memref<128x1xi32, #tpu.memory_space<vmem>>, vector<128x1xi32>
    %5 = vector.broadcast %4 : vector<128x1xi32> to vector<128x34xi32>
    %6 = arith.cmpi eq, %0, %5 : vector<128x34xi32>
    %7 = arith.ori %3, %6 : vector<128x34xi1>
    %c0_3 = arith.constant 0 : index
    %c0_4 = arith.constant 0 : index
    %8 = vector.load %arg3[%c0_3, %c0_4] : memref<128x1xi32, #tpu.memory_space<vmem>>, vector<128x1xi32>
    %9 = vector.broadcast %8 : vector<128x1xi32> to vector<128x34xi32>
    %10 = arith.cmpi eq, %0, %9 : vector<128x34xi32>
    %11 = arith.ori %7, %10 : vector<128x34xi1>
    %12 = arith.extui %11 : vector<128x34xi1> to vector<128x34xi32>
    %13 = arith.sitofp %12 : vector<128x34xi32> to vector<128x34xf32>
    %c0_5 = arith.constant 0 : index
    %c0_6 = arith.constant 0 : index
    %14 = vector.load %arg4[%c0_5, %c0_6] : memref<128x8xf32, #tpu.memory_space<vmem>>, vector<128x8xf32>
    %c0_7 = arith.constant 0 : index
    %c0_8 = arith.constant 0 : index
    %15 = vector.load %arg5[%c0_7, %c0_8] : memref<8x128xf32, #tpu.memory_space<vmem>>, vector<8x128xf32>
    %cst = arith.constant dense<0.000000e+00> : vector<128x128xf32>
    %16 = tpu.matmul %14, %15, %cst {dimension_numbers = #tpu.dot_dimension_numbers<[1], [0], [0], [1], [0, 0, 1, 1], [], []>} : vector<128x8xf32>, vector<8x128xf32>, vector<128x128xf32> -> vector<128x128xf32>
    %c0_9 = arith.constant 0 : index
    %c0_10 = arith.constant 0 : index
    %17 = vector.load %arg6[%c0_9, %c0_10] : memref<34x128xf32, #tpu.memory_space<vmem>>, vector<34x128xf32>
    %cst_11 = arith.constant dense<0.000000e+00> : vector<128x128xf32>
    %18 = tpu.matmul %13, %17, %cst_11 {dimension_numbers = #tpu.dot_dimension_numbers<[1], [0], [0], [1], [0, 0, 1, 1], [], []>} : vector<128x34xf32>, vector<34x128xf32>, vector<128x128xf32> -> vector<128x128xf32>
    %19 = arith.addf %16, %18 : vector<128x128xf32>
    %c0_12 = arith.constant 0 : index
    %c0_13 = arith.constant 0 : index
    %20 = vector.load %arg7[%c0_12, %c0_13] : memref<128x128xf32, #tpu.memory_space<vmem>>, vector<128x128xf32>
    tpu.vector_store %arg7[%c0_12, %c0_13], %19 {strides = array<i32>} : memref<128x128xf32, #tpu.memory_space<vmem>>, vector<128x128xf32>,
    return
  }
  func.func @transform_0(%arg0: i32) -> (i32, i32) {
    %c0_i32 = arith.constant 0 : i32
    %c0_i32_0 = arith.constant 0 : i32
    return %arg0, %c0_i32 : i32, i32
  }
  func.func @transform_1(%arg0: i32) -> (i32, i32) {
    %c0_i32 = arith.constant 0 : i32
    %c0_i32_0 = arith.constant 0 : i32
    return %arg0, %c0_i32 : i32, i32
  }
  func.func @transform_2(%arg0: i32) -> (i32, i32) {
    %c0_i32 = arith.constant 0 : i32
    %c0_i32_0 = arith.constant 0 : i32
    return %arg0, %c0_i32 : i32, i32
  }
  func.func @transform_3(%arg0: i32) -> (i32, i32) {
    %c0_i32 = arith.constant 0 : i32
    %c0_i32_0 = arith.constant 0 : i32
    return %arg0, %c0_i32 : i32, i32
  }
  func.func @transform_4(%arg0: i32) -> (i32, i32) {
    %c0_i32 = arith.constant 0 : i32
    %c0_i32_0 = arith.constant 0 : i32
    %c0_i32_1 = arith.constant 0 : i32
    return %c0_i32, %c0_i32_0 : i32, i32
  }
  func.func @transform_5(%arg0: i32) -> (i32, i32) {
    %c0_i32 = arith.constant 0 : i32
    %c0_i32_0 = arith.constant 0 : i32
    %c0_i32_1 = arith.constant 0 : i32
    return %c0_i32, %c0_i32_0 : i32, i32
  }
  func.func @transform_6(%arg0: i32) -> (i32, i32) {
    %c0_i32 = arith.constant 0 : i32
    %c0_i32_0 = arith.constant 0 : i32
    return %arg0, %c0_i32 : i32, i32
  }
}

</mosaic_0001>

<bundles_post_ra>
// kernel: tpu_custom_call.1
= control target key start
LH: loop header
LB: loop body
LE: loop exit
PB: predicated region body
PF: predicated region fallthrough
CT: control target
= control target key end

     0   :  { %11 = vsyncpa [#allocation3], 0  ;;  %s1828_s0 = inlined_call_operand.vmem [shape: s32[256,1], index: 0, kind: input, shape index: {}]   ;;  %s1829_s1 = inlined_call_operand.vmem [shape: s32[256,1], index: 1, kind: input, shape index: {}]   ;;  %s1830_s2 = inlined_call_operand.vmem [shape: s32[256,1], index: 2, kind: input, shape index: {}]   ;;  %s1831_s3 = inlined_call_operand.vmem [shape: f32[256,8], index: 3, kind: input, shape index: {}]   ;;  %s1832_s4 = inlined_call_operand.vmem [shape: f32[8,128], index: 4, kind: input, shape index: {}]   ;;  %s1833_s5 = inlined_call_operand.vmem [shape: f32[34,128], index: 5, kind: input, shape index: {}]   ;;  %s1834_s6 = inlined_call_operand.hbm [shape: f32[256,128], index: 6, kind: output, shape index: {}]  }
   0x1   :  { %13 = vsyncpa [#allocation3 + $0x1], 0  ;;  %s1506_s21 = smov 0   ;;  %s1508_s22 = smov 0  }
   0x2   :  { %s1510_s23 = smov 0   ;;  %s1512_s24 = smov 0  }
   0x3 LB: > { %s1527_s25 = sadd.s32 4294967295, %s1464_s24   ;;  %s1167_s26 = sadd.s32 4294967294, %s1464_s24   ;;  %s1464_s24 = sphi %s1512_s24, %s1840_s24   ;;  %s1460_s23 = sphi %s1510_s23, %s1839_s23   ;;  %s1456_s22 = sphi %s1508_s22, %s1838_s22   ;;  %s1452_s21 = sphi %s1506_s21, %s1837_s21  }
   0x4   : > { %s1531_s27 = sadd.s32 1, %s1464_s24   ;;  %s172_s28 = sadd.s32 1, %s1460_s23 }
   0x5   : > { %s169_s29 = ssub.s32 %s1464_s24, %s1531_s27  ;;  %p182_p0 = scmp.ne.s32.totalorder %s1460_s23, %s1456_s22 }
   0x6   : > { %p170_p1 = scmp.eq.s32.totalorder %s169_s29, 0  ;;  %p183_p2 = scmp.eq.s32.totalorder %s1527_s25, 1 }
   0x7   : > { %p188_p3 = scmp.ne.s32.totalorder %s1456_s22, %s1452_s21  ;;  %p189_p4 = scmp.eq.s32.totalorder %s1167_s26, 1 }
   0x8   : > { %s1542_s30 = scalar_select %p170_p1, %s1460_s23, %s172_s28  }
   0x9   : > { %p1544_p5 = por %p183_p2, %p182_p0  ;;  %p1548_p6 = por %p189_p4, %p188_p3 }
   0xa   : > { %p1170_p7 = scmp.ge.s32.totalorder %s1464_s24, 1  ;;  %p249_p8 = scmp.lt.s32.totalorder %s1464_s24, 3 }
   0xc   : > { %p250_p9 = pnand %p1170_p7, %p249_p8 }
   0xd   : > { %s1172_s9 = sshll.u32 (!%p250_p9), %s1527_s25, 4  ;;  %v1466_v0 = vmov (!%p250_p9), 0   ;;  %v642_v11 = vld [vmem:[%s1833_s5] sm:$0xff] (!%p250_p9)  ;;  %v643_v12 = vld [vmem:[%s1833_s5 + $0x8] sm:$0xff] (!%p250_p9)  ;;  %v644_v13 = vld [vmem:[%s1833_s5 + $0x10] sm:$0xff] (!%p250_p9)  ;;  %vm845_vm0 = vcmask (!%p250_p9), 64512  }
   0xe   : > { %253 = sbr.rel (%p250_p9) target bundleno = 480 (0x1e0), region = 44  ;;  %1401 = vset.pattern.permute.xlu1 (!%p250_p9), %v1466_v0  ;;  %1400 = vset.pattern.permute.xlu0 (!%p250_p9), %v1466_v0  ;;  %p295_p10 = scmp.lt.s32.totalorder (!%p250_p9), %s1172_s9, 31  ;;  %v1333_v14 = vpack.c.bf16 (!%p250_p9), %v643_v12, %v642_v11  ;;  %v645_v15 = vld [vmem:[%s1833_s5 + $0x18] sm:$0xff] (!%p250_p9)  ;;  %v641_v16 = vld [vmem:[%s1832_s4] sm:$0xff] (!%p250_p9)  ;;  %vm696_vm1 = vcmask (!%p250_p9), 1041408   ;;  %vm647_vm11 = vcmask (!%p250_p9), 277504  }
   0xf   : > { %v1337_v19 = vpack.c.bf16 (!%p250_p9), %v645_v15, %v644_v13  ;;  %1307 = vmatprep.subr.mxu0 (!%p250_p9), %v641_v16  ;;  %v646_v24 = vld [vmem:[%s1833_s5 + $0x20] sm:$0x3] (!%p250_p9)  ;;  %s1468_s17 = smov (!%p250_p9), [#allocation2]  }
  0x10   : > { %1334 = vmatprep.subr.bf16.mxu1 (!%p250_p9), %v1333_v14  ;;  %1308 = vmatpush3.msra.mxu0 (!%p250_p9), %v641_v16 }
  0x11   : > { %1336 = vmatpush3.bf16.msra.mxu1 (!%p250_p9), %v1333_v14 }
  0x12   : > { %1338 = vmatprep.subr.bf16.mxu1 (!%p250_p9), %v1337_v19 }
  0x15   : > { %s1842_s9 = smov (!%p295_p10, %s1172_s9), 31  ;;  %1340 = vmatpush3.bf16.msra.mxu1 %v1337_v19 }
  0x16   : > { %s1173_s10 = sshll.u32 %s1842_s9, 3  ;;  %1281 = vmatprep.subr.msk.mxu1 %vm696_vm1, %v646_v24 }
  0x17   : > { %s1558_s13 = scalar_lea.vmem %s1828_s0, %s1173_s10  ;;  %s1563_s16 = scalar_lea.vmem %s1829_s1, %s1173_s10 }
  0x18   : > { %v322_v1 = vld [vmem:[%s1558_s13 + $0x8] sm:$0xff]  ;;  %v321_v2 = vld [vmem:[%s1558_s13] sm:$0xff]  ;;  %s1572_s19 = scalar_lea.vmem %s1830_s2, %s1173_s10  ;;  %v403_v7 = vld [vmem:[%s1563_s16 + $0x10] sm:$0xff]  ;;  %s1583_s28 = scalar_lea.vmem %s1831_s3, %s1173_s10 }
  0x19   : > { %341 = vperm.xlu1 %1401, %v322_v1   ;;  %338 = vperm.xlu0 %1400, %v321_v2   ;;  %v402_v3 = vld [vmem:[%s1563_s16 + $0x8] sm:$0xff]  ;;  %v401_v4 = vld [vmem:[%s1563_s16] sm:$0xff]  ;;  %v323_v8 = vld [vmem:[%s1558_s13 + $0x10] sm:$0xff]  ;;  %s1406_s10 = sshll.u32 %s1468_s17, 4  ;;  %s1407_s10 = int_to_ptr.vmem [resolvable:$false] %s1406_s10 }
  0x1a   : > { %v498_v5 = vld [vmem:[%s1572_s19 + $0x8] sm:$0xff]  ;;  %v497_v6 = vld [vmem:[%s1572_s19] sm:$0xff]  ;;  %v404_v9 = vld [vmem:[%s1563_s16 + $0x18] sm:$0xff]  ;;  %1282 = vmatpush3.msk.msra.mxu1 %vm696_vm1, %v646_v24  ;;  %s1408_s18 = scalar_lea.vmem %s1407_s10, 4096 }
  0x1b   : > { %v324_v10 = vld [vmem:[%s1558_s13 + $0x18] sm:$0xff]  ;;  %v499_v18 = vld [vmem:[%s1572_s19 + $0x10] sm:$0xff]  ;;  %v625_v20 = vld [vmem:[%s1583_s28] sm:$0xff] }
  0x1c   : > { %v500_v17 = vld [vmem:[%s1572_s19 + $0x18] sm:$0xff]  ;;  %v626_v21 = vld [vmem:[%s1583_s28 + $0x8] sm:$0xff]  ;;  %1309 = vmatprep.mubr.msk.f32.mxu0 %vm845_vm0, %v625_v20  ;;  %v405_v22 = vld [vmem:[%s1563_s16 + $0x20] sm:$0xff] }
  0x1d   : > { %421 = vperm.xlu1 %1401, %v402_v3   ;;  %418 = vperm.xlu0 %1400, %v401_v4   ;;  %v325_v23 = vld [vmem:[%s1558_s13 + $0x20] sm:$0xff]  ;;  %v627_v25 = vld [vmem:[%s1583_s28 + $0x10] sm:$0xff]  ;;  %v628_v26 = vld [vmem:[%s1583_s28 + $0x18] sm:$0xff] }
  0x1e   : > { %1310 = vmatmul.mubr.msk.f32.vlgmr.msra.gmra.mrb[0].mxu0 %vm845_vm0, %v626_v21  ;;  %v406_v27 = vld [vmem:[%s1563_s16 + $0x28] sm:$0xff]  ;;  %v501_v30 = vld [vmem:[%s1572_s19 + $0x20] sm:$0xff]  ;;  %v407_v31 = vld [vmem:[%s1563_s16 + $0x30] sm:$0xff] }
  0x1f   : > { %v326_v28 = vld [vmem:[%s1558_s13 + $0x28] sm:$0xff]  ;;  %1312 = vmatprep.mubr.msk.f32.mxu0 %vm845_vm0, %v627_v25  ;;  %v327_v32 = vld [vmem:[%s1558_s13 + $0x30] sm:$0xff]  ;;  %v629_v33 = vld [vmem:[%s1583_s28 + $0x20] sm:$0xff] }
  0x20   : > { %v502_v29 = vld [vmem:[%s1572_s19 + $0x28] sm:$0xff]  ;;  %v408_v35 = vld [vmem:[%s1563_s16 + $0x38] sm:$0xff]  ;;  %v503_v38 = vld [vmem:[%s1572_s19 + $0x30] sm:$0xff] }
  0x21   : > { %517 = vperm.xlu1 %1401, %v498_v5   ;;  %514 = vperm.xlu0 %1400, %v497_v6   ;;  %v630_v34 = vld [vmem:[%s1583_s28 + $0x28] sm:$0xff]  ;;  %v328_v36 = vld [vmem:[%s1558_s13 + $0x38] sm:$0xff]  ;;  %v409_v39 = vld [vmem:[%s1563_s16 + $0x40] sm:$0xff] }
  0x22   : > { %1313 = vmatmul.mubr.msk.f32.gmra.mrb[2].mxu0 %vm845_vm0, %v628_v26  ;;  %v504_v37 = vld [vmem:[%s1572_s19 + $0x38] sm:$0xff]  ;;  %v329_v40 = vld [vmem:[%s1558_s13 + $0x40] sm:$0xff]  ;;  %v631_v41 = vld [vmem:[%s1583_s28 + $0x30] sm:$0xff] }
  0x23   : > { %1315 = vmatprep.mubr.msk.f32.mxu0 %vm845_vm0, %v629_v33  ;;  %v632_v42 = vld [vmem:[%s1583_s28 + $0x38] sm:$0xff]  ;;  %v410_v43 = vld [vmem:[%s1563_s16 + $0x48] sm:$0xff]  ;;  %v505_v46 = vld [vmem:[%s1572_s19 + $0x40] sm:$0xff] }
  0x24   : > { %v330_v44 = vld [vmem:[%s1558_s13 + $0x48] sm:$0xff]  ;;  %v411_v47 = vld [vmem:[%s1563_s16 + $0x50] sm:$0xff]  ;;  %v633_v49 = vld [vmem:[%s1583_s28 + $0x40] sm:$0xff] }
  0x25   : > { %424 = vperm.xlu1 %1401, %v403_v7   ;;  %344 = vperm.xlu0 %1400, %v323_v8   ;;  %v506_v45 = vld [vmem:[%s1572_s19 + $0x48] sm:$0xff]  ;;  %v331_v48 = vld [vmem:[%s1558_s13 + $0x50] sm:$0xff]  ;;  %v412_v51 = vld [vmem:[%s1563_s16 + $0x58] sm:$0xff] }
  0x26   : > { %1316 = vmatmul.mubr.msk.f32.gmra.mrb[4].mxu0 %vm845_vm0, %v630_v34  ;;  %v634_v50 = vld [vmem:[%s1583_s28 + $0x48] sm:$0xff]  ;;  %v332_v52 = vld [vmem:[%s1558_s13 + $0x58] sm:$0xff]  ;;  %v507_v54 = vld [vmem:[%s1572_s19 + $0x50] sm:$0xff] }
  0x27   : > { %1318 = vmatprep.mubr.msk.f32.mxu0 %vm845_vm0, %v631_v41  ;;  %v508_v53 = vld [vmem:[%s1572_s19 + $0x58] sm:$0xff]  ;;  %v413_v55 = vld [vmem:[%s1563_s16 + $0x60] sm:$0xff]  ;;  %v635_v57 = vld [vmem:[%s1583_s28 + $0x50] sm:$0xff] }
  0x28   : > { %v333_v56 = vld [vmem:[%s1558_s13 + $0x60] sm:$0xff]  ;;  %v636_v58 = vld [vmem:[%s1583_s28 + $0x58] sm:$0xff]  ;;  %v414_v59 = vld [vmem:[%s1563_s16 + $0x68] sm:$0xff] }
  0x29   : > { %427 = vperm.xlu1 %1401, %v404_v9   ;;  %347 = vperm.xlu0 %1400, %v324_v10   ;;  %v334_v60 = vld [vmem:[%s1558_s13 + $0x68] sm:$0xff]  ;;  %v509_v62 = vld [vmem:[%s1572_s19 + $0x60] sm:$0xff]  ;;  %v415_v63 = vld [vmem:[%s1563_s16 + $0x70] sm:$0xff]  ;;  %v319_v9 = vlaneseq }
  0x2a   : > { %1319 = vmatmul.mubr.msk.f32.gmra.mrb[6].mxu0 %vm845_vm0, %v632_v42  ;;  %v510_v61 = vld [vmem:[%s1572_s19 + $0x68] sm:$0xff]  ;;  %v335_v0 = vld [vmem:[%s1558_s13 + $0x70] sm:$0xff]  ;;  %v637_v1 = vld [vmem:[%s1583_s28 + $0x60] sm:$0xff] }
  0x2b   : > { %1321 = vmatprep.mubr.msk.f32.mxu0 %vm845_vm0, %v633_v49  ;;  %v638_v2 = vld [vmem:[%s1583_s28 + $0x68] sm:$0xff]  ;;  %v416_v3 = vld [vmem:[%s1563_s16 + $0x78] sm:$0xff]  ;;  %v511_v6 = vld [vmem:[%s1572_s19 + $0x70] sm:$0xff]  ;;  %v1673_v12 = vand.u32 127, %v319_v9 }
  0x2c   : > { %v336_v4 = vld [vmem:[%s1558_s13 + $0x78] sm:$0xff]  ;;  %v639_v7 = vld [vmem:[%s1583_s28 + $0x70] sm:$0xff]  ;;  %s291_s13 = sand.u32 1, %s1456_s22  }
  0x2d   : > { %523 = vperm.xlu1 %1401, %v500_v17   ;;  %520 = vperm.xlu0 %1400, %v499_v18   ;;  %v512_v5 = vld [vmem:[%s1572_s19 + $0x78] sm:$0xff]  ;;  %v1467_v17 = vmov 0.0   ;;  %s1171_s16 = sshll.u32 %s291_s13, 7  ;;  %s1787_s15 = scalar_lea.sflag [#allocation3], %s291_s13 }
  0x2e   : > { %1322 = vmatmul.mubr.msk.f32.gmra.mrb[8].mxu0 %vm845_vm0, %v634_v50  ;;  %v640_v8 = vld [vmem:[%s1583_s28 + $0x78] sm:$0xff]  ;;  %s1758_s19 = scalar_lea.vmem [#allocation2], %s1171_s16  ;;  %s1234_s28 = sshll.u32 %s1527_s25, 11 }
  0x2f   : > { %1324 = vmatprep.mubr.msk.f32.mxu0 %vm845_vm0, %v635_v57  ;;  %s1069_s9 = sshll.u32 %s1758_s19, 4  ;;  %s1779_s14 = scalar_lea.hbm %s1834_s6, %s1234_s28  ;;  %s1781_s9 = int_to_ptr.vmem [resolvable:$true] %s1069_s9 }
  0x30   : > { %s1402_s25 = scalar_lea.vmem %s1781_s9, 2048  ;;  %p1409_p0 = scmp.lt.s32.totalorder %s1781_s9, %s1407_s10 }
  0x31   : > { %430 = vperm.xlu1 %1401, %v405_v22   ;;  %350 = vperm.xlu0 %1400, %v325_v23   ;;  %p1403_p11 = scmp.ne.s32.totalorder %s1781_s9, %s1402_s25  ;;  %p1410_p1 = scmp.lt.s32.totalorder %s1408_s18, %s1402_s25 }
  0x32   : > { %1325 = vmatmul.mubr.msk.f32.gmra.mrb[10].mxu0 %vm845_vm0, %v636_v58 }
  0x33   : > { %1327 = vmatprep.mubr.msk.f32.mxu0 %vm845_vm0, %v637_v1  ;;  %p1404_p12 = pnand %p1403_p11, %p1544_p5  ;;  %p1411_p2 = por %p1410_p1, %p1409_p0 }
  0x35   : > { %433 = vperm.xlu1 %1401, %v406_v27   ;;  %353 = vperm.xlu0 %1400, %v326_v28   ;;  %p1405_p13 = pneg %p1404_p12 }
  0x36   : > { %1328 = vmatmul.mubr.msk.f32.gmra.mrb[12].mxu0 %vm845_vm0, %v638_v2 }
  0x37   : > { %1330 = vmatprep.mubr.msk.f32.mxu0 %vm845_vm0, %v639_v7  ;;  %p1412_p3 = pnand %p1411_p2, %p1405_p13 }
  0x39   : > { %529 = vperm.xlu1 %1401, %v502_v29   ;;  %526 = vperm.xlu0 %1400, %v501_v30  }
  0x3a   : > { %1331 = vmatmul.mubr.msk.f32.gmra.mrb[14].mxu0 %vm845_vm0, %v640_v8 }
  0x3d   : > { %436 = vperm.xlu1 %1401, %v407_v31   ;;  %356 = vperm.xlu0 %1400, %v327_v32  }
  0x41   : > { %439 = vperm.xlu1 %1401, %v408_v35   ;;  %359 = vperm.xlu0 %1400, %v328_v36  }
  0x45   : > { %535 = vperm.xlu1 %1401, %v504_v37   ;;  %532 = vperm.xlu0 %1400, %v503_v38  }
  0x49   : > { %442 = vperm.xlu1 %1401, %v409_v39   ;;  %362 = vperm.xlu0 %1400, %v329_v40  }
  0x4d   : > { %445 = vperm.xlu1 %1401, %v410_v43   ;;  %365 = vperm.xlu0 %1400, %v330_v44  }
  0x51   : > { %541 = vperm.xlu1 %1401, %v506_v45   ;;  %538 = vperm.xlu0 %1400, %v505_v46  }
  0x55   : > { %448 = vperm.xlu1 %1401, %v411_v47   ;;  %368 = vperm.xlu0 %1400, %v331_v48  }
  0x59   : > { %451 = vperm.xlu1 %1401, %v412_v51   ;;  %371 = vperm.xlu0 %1400, %v332_v52  }
  0x5d   : > { %547 = vperm.xlu1 %1401, %v508_v53   ;;  %544 = vperm.xlu0 %1400, %v507_v54  }
  0x61   : > { %454 = vperm.xlu1 %1401, %v413_v55   ;;  %374 = vperm.xlu0 %1400, %v333_v56  }
  0x65   : > { %457 = vperm.xlu1 %1401, %v414_v59   ;;  %377 = vperm.xlu0 %1400, %v334_v60  }
  0x69   : > { %553 = vperm.xlu1 %1401, %v510_v61   ;;  %550 = vperm.xlu0 %1400, %v509_v62  }
  0x6d   : > { %460 = vperm.xlu1 %1401, %v415_v63   ;;  %380 = vperm.xlu0 %1400, %v335_v0  }
  0x71   : > { %463 = vperm.xlu1 %1401, %v416_v3   ;;  %383 = vperm.xlu0 %1400, %v336_v4  }
  0x75   : > { %559 = vperm.xlu1 %1401, %v512_v5   ;;  %556 = vperm.xlu0 %1400, %v511_v6  }
  0x98   : > { %v342_v10 = vpop.permute.xlu1 %341  ;;  %v339_v11 = vpop.permute.xlu0 %338 }
  0x99   : > { %vm386_vm4 = vcmp.eq.s32.totalorder %v1673_v12, %v342_v10  ;;  %vm385_vm5 = vcmp.eq.s32.totalorder %v1673_v12, %v339_v11 }
  0x9c   : > { %v422_v13 = vpop.permute.xlu1 %421  ;;  %v419_v14 = vpop.permute.xlu0 %418 }
  0x9d   : > { %vm466_vm2 = vcmp.eq.s32.totalorder %v1673_v12, %v422_v13  ;;  %vm465_vm3 = vcmp.eq.s32.totalorder %v1673_v12, %v419_v14 }
  0x9e   : > { %vm482_vm6 = vmor %vm386_vm4, %vm466_vm2 }
  0x9f   : > { %vm481_vm7 = vmor %vm385_vm5, %vm465_vm3 }
  0xa0   : > { %v518_v15 = vpop.permute.xlu1 %517  ;;  %v515_v16 = vpop.permute.xlu0 %514 }
  0xa1   : > { %vm562_vm8 = vcmp.eq.s32.totalorder %v1673_v12, %v518_v15  ;;  %vm561_vm9 = vcmp.eq.s32.totalorder %v1673_v12, %v515_v16 }
  0xa2   : > { %vm578_vm10 = vmor %vm482_vm6, %vm562_vm8 }
  0xa3   : > { %v1181_v18 = vsel %vm578_vm10, 1.0, %v1467_v17  ;;  %vm577_vm12 = vmor %vm481_vm7, %vm561_vm9 }
  0xa4   : > { %v425_v19 = vpop.permute.xlu1 %424  ;;  %v1180_v20 = vsel %vm577_vm12, 1.0, %v1467_v17  ;;  %v345_v21 = vpop.permute.xlu0 %344 }
  0xa5   : > { %1283 = vmatprep.mubr.msk.f32.mxu1 %vm647_vm11, %v1180_v20  ;;  %vm467_vm13 = vcmp.eq.s32.totalorder %v1673_v12, %v425_v19  ;;  %vm387_vm14 = vcmp.eq.s32.totalorder %v1673_v12, %v345_v21 }
  0xa6   : > { %1284 = vmatmul.mubr.msk.f32.vlgmr.msra.gmra.mrb[0].mxu1 %vm647_vm11, %v1181_v18  ;;  %vm483_vm1 = vmor %vm387_vm14, %vm467_vm13 }
  0xa8   : > { %v428_v22 = vpop.permute.xlu1 %427  ;;  %v348_v23 = vpop.permute.xlu0 %347 }
  0xa9   : > { %vm468_vm15 = vcmp.eq.s32.totalorder %v1673_v12, %v428_v22  ;;  %vm388_vm0 = vcmp.eq.s32.totalorder %v1673_v12, %v348_v23 }
  0xaa   : > { %vm484_vm2 = vmor %vm388_vm0, %vm468_vm15 }
  0xac   : > { %v524_v24 = vpop.permute.xlu1 %523  ;;  %v521_v25 = vpop.permute.xlu0 %520 }
  0xad   : > { %vm564_vm3 = vcmp.eq.s32.totalorder %v1673_v12, %v524_v24  ;;  %vm563_vm4 = vcmp.eq.s32.totalorder %v1673_v12, %v521_v25 }
  0xae   : > { %vm580_vm5 = vmor %vm484_vm2, %vm564_vm3 }
  0xaf   : > { %v1183_v26 = vsel %vm580_vm5, 1.0, %v1467_v17  ;;  %vm579_vm6 = vmor %vm483_vm1, %vm563_vm4 }
  0xb0   : > { %v1182_v27 = vsel %vm579_vm6, 1.0, %v1467_v17  ;;  %v431_v28 = vpop.permute.xlu1 %430  ;;  %v351_v29 = vpop.permute.xlu0 %350 }
  0xb1   : > { %1286 = vmatprep.mubr.msk.f32.mxu1 %vm647_vm11, %v1182_v27  ;;  %vm469_vm7 = vcmp.eq.s32.totalorder %v1673_v12, %v431_v28  ;;  %vm389_vm8 = vcmp.eq.s32.totalorder %v1673_v12, %v351_v29 }
  0xb2   : > { %1287 = vmatmul.mubr.msk.f32.gmra.mrb[2].mxu1 %vm647_vm11, %v1183_v26  ;;  %vm485_vm12 = vmor %vm389_vm8, %vm469_vm7 }
  0xb4   : > { %v434_v30 = vpop.permute.xlu1 %433  ;;  %v354_v31 = vpop.permute.xlu0 %353 }
  0xb5   : > { %vm470_vm9 = vcmp.eq.s32.totalorder %v1673_v12, %v434_v30  ;;  %vm390_vm10 = vcmp.eq.s32.totalorder %v1673_v12, %v354_v31 }
  0xb6   : > { %vm486_vm13 = vmor %vm390_vm10, %vm470_vm9 }
  0xb8   : > { %v530_v32 = vpop.permute.xlu1 %529  ;;  %v527_v33 = vpop.permute.xlu0 %526 }
  0xb9   : > { %vm566_vm14 = vcmp.eq.s32.totalorder %v1673_v12, %v530_v32  ;;  %vm565_vm15 = vcmp.eq.s32.totalorder %v1673_v12, %v527_v33 }
  0xba   : > { %vm582_vm0 = vmor %vm486_vm13, %vm566_vm14 }
  0xbb   : > { %v1185_v34 = vsel %vm582_vm0, 1.0, %v1467_v17  ;;  %vm581_vm1 = vmor %vm485_vm12, %vm565_vm15 }
  0xbc   : > { %v1184_v35 = vsel %vm581_vm1, 1.0, %v1467_v17  ;;  %v437_v36 = vpop.permute.xlu1 %436  ;;  %v357_v37 = vpop.permute.xlu0 %356 }
  0xbd   : > { %1289 = vmatprep.mubr.msk.f32.mxu1 %vm647_vm11, %v1184_v35  ;;  %vm471_vm2 = vcmp.eq.s32.totalorder %v1673_v12, %v437_v36  ;;  %vm391_vm3 = vcmp.eq.s32.totalorder %v1673_v12, %v357_v37 }
  0xbe   : > { %1290 = vmatmul.mubr.msk.f32.gmra.mrb[4].mxu1 %vm647_vm11, %v1185_v34  ;;  %vm487_vm6 = vmor %vm391_vm3, %vm471_vm2 }
  0xc0   : > { %v440_v38 = vpop.permute.xlu1 %439  ;;  %v360_v39 = vpop.permute.xlu0 %359 }
  0xc1   : > { %vm472_vm4 = vcmp.eq.s32.totalorder %v1673_v12, %v440_v38  ;;  %vm392_vm5 = vcmp.eq.s32.totalorder %v1673_v12, %v360_v39 }
  0xc2   : > { %vm488_vm7 = vmor %vm392_vm5, %vm472_vm4 }
  0xc4   : > { %v536_v40 = vpop.permute.xlu1 %535  ;;  %v533_v41 = vpop.permute.xlu0 %532 }
  0xc5   : > { %vm568_vm8 = vcmp.eq.s32.totalorder %v1673_v12, %v536_v40  ;;  %vm567_vm9 = vcmp.eq.s32.totalorder %v1673_v12, %v533_v41 }
  0xc6   : > { %vm584_vm10 = vmor %vm488_vm7, %vm568_vm8 }
  0xc7   : > { %v1187_v42 = vsel %vm584_vm10, 1.0, %v1467_v17  ;;  %vm583_vm12 = vmor %vm487_vm6, %vm567_vm9 }
  0xc8   : > { %v1186_v43 = vsel %vm583_vm12, 1.0, %v1467_v17  ;;  %v443_v44 = vpop.permute.xlu1 %442  ;;  %v363_v45 = vpop.permute.xlu0 %362 }
  0xc9   : > { %1292 = vmatprep.mubr.msk.f32.mxu1 %vm647_vm11, %v1186_v43  ;;  %vm473_vm13 = vcmp.eq.s32.totalorder %v1673_v12, %v443_v44  ;;  %vm393_vm14 = vcmp.eq.s32.totalorder %v1673_v12, %v363_v45 }
  0xca   : > { %1293 = vmatmul.mubr.msk.f32.gmra.mrb[6].mxu1 %vm647_vm11, %v1187_v42  ;;  %vm489_vm1 = vmor %vm393_vm14, %vm473_vm13 }
  0xcc   : > { %v446_v46 = vpop.permute.xlu1 %445  ;;  %v366_v47 = vpop.permute.xlu0 %365 }
  0xcd   : > { %vm474_vm15 = vcmp.eq.s32.totalorder %v1673_v12, %v446_v46  ;;  %vm394_vm0 = vcmp.eq.s32.totalorder %v1673_v12, %v366_v47 }
  0xce   : > { %vm490_vm2 = vmor %vm394_vm0, %vm474_vm15 }
  0xd0   : > { %v542_v48 = vpop.permute.xlu1 %541  ;;  %v539_v49 = vpop.permute.xlu0 %538 }
  0xd1   : > { %vm570_vm3 = vcmp.eq.s32.totalorder %v1673_v12, %v542_v48  ;;  %vm569_vm4 = vcmp.eq.s32.totalorder %v1673_v12, %v539_v49 }
  0xd2   : > { %vm586_vm5 = vmor %vm490_vm2, %vm570_vm3 }
  0xd3   : > { %v1189_v50 = vsel %vm586_vm5, 1.0, %v1467_v17  ;;  %vm585_vm6 = vmor %vm489_vm1, %vm569_vm4 }
  0xd4   : > { %v1188_v51 = vsel %vm585_vm6, 1.0, %v1467_v17  ;;  %v449_v52 = vpop.permute.xlu1 %448  ;;  %v369_v53 = vpop.permute.xlu0 %368 }
  0xd5   : > { %1295 = vmatprep.mubr.msk.f32.mxu1 %vm647_vm11, %v1188_v51  ;;  %vm475_vm7 = vcmp.eq.s32.totalorder %v1673_v12, %v449_v52  ;;  %vm395_vm8 = vcmp.eq.s32.totalorder %v1673_v12, %v369_v53 }
  0xd6   : > { %1296 = vmatmul.mubr.msk.f32.gmra.mrb[8].mxu1 %vm647_vm11, %v1189_v50  ;;  %vm491_vm12 = vmor %vm395_vm8, %vm475_vm7 }
  0xd8   : > { %v452_v54 = vpop.permute.xlu1 %451  ;;  %v372_v55 = vpop.permute.xlu0 %371 }
  0xd9   : > { %vm476_vm9 = vcmp.eq.s32.totalorder %v1673_v12, %v452_v54  ;;  %vm396_vm10 = vcmp.eq.s32.totalorder %v1673_v12, %v372_v55 }
  0xda   : > { %vm492_vm13 = vmor %vm396_vm10, %vm476_vm9 }
  0xdc   : > { %v548_v56 = vpop.permute.xlu1 %547  ;;  %v545_v57 = vpop.permute.xlu0 %544 }
  0xdd   : > { %vm572_vm14 = vcmp.eq.s32.totalorder %v1673_v12, %v548_v56  ;;  %vm571_vm15 = vcmp.eq.s32.totalorder %v1673_v12, %v545_v57 }
  0xde   : > { %vm588_vm0 = vmor %vm492_vm13, %vm572_vm14 }
  0xdf   : > { %v1191_v58 = vsel %vm588_vm0, 1.0, %v1467_v17  ;;  %vm587_vm1 = vmor %vm491_vm12, %vm571_vm15 }
  0xe0   : > { %v1190_v59 = vsel %vm587_vm1, 1.0, %v1467_v17  ;;  %v455_v60 = vpop.permute.xlu1 %454  ;;  %v375_v61 = vpop.permute.xlu0 %374 }
  0xe1   : > { %1298 = vmatprep.mubr.msk.f32.mxu1 %vm647_vm11, %v1190_v59  ;;  %vm477_vm2 = vcmp.eq.s32.totalorder %v1673_v12, %v455_v60  ;;  %vm397_vm3 = vcmp.eq.s32.totalorder %v1673_v12, %v375_v61 }
  0xe2   : > { %1299 = vmatmul.mubr.msk.f32.gmra.mrb[10].mxu1 %vm647_vm11, %v1191_v58  ;;  %vm493_vm6 = vmor %vm397_vm3, %vm477_vm2 }
  0xe4   : > { %v458_v62 = vpop.permute.xlu1 %457  ;;  %v378_v63 = vpop.permute.xlu0 %377 }
  0xe5   : > { %vm478_vm4 = vcmp.eq.s32.totalorder %v1673_v12, %v458_v62  ;;  %vm398_vm5 = vcmp.eq.s32.totalorder %v1673_v12, %v378_v63 }
  0xe6   : > { %vm494_vm7 = vmor %vm398_vm5, %vm478_vm4 }
  0xe8   : > { %v554_v0 = vpop.permute.xlu1 %553  ;;  %v551_v1 = vpop.permute.xlu0 %550 }
  0xe9   : > { %vm574_vm8 = vcmp.eq.s32.totalorder %v1673_v12, %v554_v0  ;;  %vm573_vm9 = vcmp.eq.s32.totalorder %v1673_v12, %v551_v1 }
  0xea   : > { %vm590_vm10 = vmor %vm494_vm7, %vm574_vm8 }
  0xeb   : > { %v1193_v2 = vsel %vm590_vm10, 1.0, %v1467_v17  ;;  %vm589_vm12 = vmor %vm493_vm6, %vm573_vm9 }
  0xec   : > { %v1192_v3 = vsel %vm589_vm12, 1.0, %v1467_v17  ;;  %v461_v4 = vpop.permute.xlu1 %460  ;;  %v381_v5 = vpop.permute.xlu0 %380 }
  0xed   : > { %1301 = vmatprep.mubr.msk.f32.mxu1 %vm647_vm11, %v1192_v3  ;;  %vm479_vm13 = vcmp.eq.s32.totalorder %v1673_v12, %v461_v4  ;;  %vm399_vm14 = vcmp.eq.s32.totalorder %v1673_v12, %v381_v5 }
  0xee   : > { %1302 = vmatmul.mubr.msk.f32.gmra.mrb[12].mxu1 %vm647_vm11, %v1193_v2  ;;  %vm495_vm1 = vmor %vm399_vm14, %vm479_vm13 }
  0xf0   : > { %v464_v6 = vpop.permute.xlu1 %463  ;;  %v384_v7 = vpop.permute.xlu0 %383 }
  0xf1   : > { %vm480_vm15 = vcmp.eq.s32.totalorder %v1673_v12, %v464_v6  ;;  %vm400_vm0 = vcmp.eq.s32.totalorder %v1673_v12, %v384_v7  ;;  %v1311_v13 = vpop.f32.mrb[0].mxu0 }
  0xf2   : > { %vm496_vm2 = vmor %vm400_vm0, %vm480_vm15  ;;  %v960_v14 = vpop.f32.mrb[1].mxu0 }
  0xf4   : > { %v560_v8 = vpop.permute.xlu1 %559  ;;  %v557_v9 = vpop.permute.xlu0 %556 }
  0xf5   : > { %vm576_vm3 = vcmp.eq.s32.totalorder %v1673_v12, %v560_v8  ;;  %vm575_vm4 = vcmp.eq.s32.totalorder %v1673_v12, %v557_v9  ;;  %v1314_v15 = vpop.f32.mrb[2].mxu0 }
  0xf6   : > { %vm592_vm5 = vmor %vm496_vm2, %vm576_vm3  ;;  %v970_v16 = vpop.f32.mrb[3].mxu0 }
  0xf7   : > { %v1195_v10 = vsel %vm592_vm5, 1.0, %v1467_v17  ;;  %vm591_vm6 = vmor %vm495_vm1, %vm575_vm4 }
  0xf8   : > { %v1194_v11 = vsel %vm591_vm6, 1.0, %v1467_v17 }
  0xf9   : > { %1304 = vmatprep.mubr.msk.f32.mxu1 %vm647_vm11, %v1194_v11  ;;  %v1317_v18 = vpop.f32.mrb[4].mxu0 }
  0xfa   : > { %1305 = vmatmul.mubr.msk.f32.gmra.mrb[14].mxu1 %vm647_vm11, %v1195_v10  ;;  %v980_v19 = vpop.f32.mrb[5].mxu0 }
  0xfd   : > { %v1320_v20 = vpop.f32.mrb[6].mxu0 }
  0xfe   : > { %v990_v12 = vpop.f32.mrb[7].mxu0 }
 0x101   : > { %v1323_v21 = vpop.f32.mrb[8].mxu0 }
 0x102   : > { %v1000_v22 = vpop.f32.mrb[9].mxu0 }
 0x105   : > { %v1326_v23 = vpop.f32.mrb[10].mxu0 }
 0x106   : > { %v1010_v24 = vpop.f32.mrb[11].mxu0 }
 0x109   : > { %v1329_v25 = vpop.f32.mrb[12].mxu0 }
 0x10a   : > { %v1020_v17 = vpop.f32.mrb[13].mxu0 }
 0x10d   : > { %v1332_v26 = vpop.f32.mrb[14].mxu0 }
 0x10e   : > { %v1030_v27 = vpop.f32.mrb[15].mxu0 }
 0x179   : > { %v1285_v28 = vpop.f32.mrb[0].mxu1 }
 0x17a   : > { %v966_v29 = vadd.f32 %v1311_v13, %v1285_v28  ;;  %v766_v30 = vpop.f32.mrb[1].mxu1 }
 0x17b   : > { %v961_v31 = vadd.f32 %v960_v14, %v766_v30 }
 0x17c   : > { %1040 = vst [vmem:[%s1758_s19 + $0x8] sm:$0xff] %v966_v29 }
 0x17d   : > { %1039 = vst [vmem:[%s1758_s19] sm:$0xff] %v961_v31 }
 0x185   : > { %v1288_v32 = vpop.f32.mrb[2].mxu1 }
 0x186   : > { %v976_v33 = vadd.f32 %v1314_v15, %v1288_v32  ;;  %v776_v34 = vpop.f32.mrb[3].mxu1 }
 0x187   : > { %v971_v35 = vadd.f32 %v970_v16, %v776_v34 }
 0x188   : > { %1042 = vst [vmem:[%s1758_s19 + $0x18] sm:$0xff] %v976_v33 }
 0x189   : > { %1041 = vst [vmem:[%s1758_s19 + $0x10] sm:$0xff] %v971_v35 }
 0x191   : > { %v1291_v36 = vpop.f32.mrb[4].mxu1 }
 0x192   : > { %v986_v37 = vadd.f32 %v1317_v18, %v1291_v36  ;;  %v786_v38 = vpop.f32.mrb[5].mxu1 }
 0x193   : > { %v981_v39 = vadd.f32 %v980_v19, %v786_v38 }
 0x194   : > { %1044 = vst [vmem:[%s1758_s19 + $0x28] sm:$0xff] %v986_v37 }
 0x195   : > { %1043 = vst [vmem:[%s1758_s19 + $0x20] sm:$0xff] %v981_v39 }
 0x19d   : > { %v1294_v40 = vpop.f32.mrb[6].mxu1 }
 0x19e   : > { %v996_v41 = vadd.f32 %v1320_v20, %v1294_v40  ;;  %v796_v42 = vpop.f32.mrb[7].mxu1 }
 0x19f   : > { %v991_v43 = vadd.f32 %v990_v12, %v796_v42 }
 0x1a0   : > { %1046 = vst [vmem:[%s1758_s19 + $0x38] sm:$0xff] %v996_v41 }
 0x1a1   : > { %1045 = vst [vmem:[%s1758_s19 + $0x30] sm:$0xff] %v991_v43 }
 0x1a9   : > { %v1297_v44 = vpop.f32.mrb[8].mxu1 }
 0x1aa   : > { %v1006_v45 = vadd.f32 %v1323_v21, %v1297_v44  ;;  %v806_v46 = vpop.f32.mrb[9].mxu1 }
 0x1ab   : > { %v1001_v47 = vadd.f32 %v1000_v22, %v806_v46 }
 0x1ac   : > { %1048 = vst [vmem:[%s1758_s19 + $0x48] sm:$0xff] %v1006_v45 }
 0x1ad   : > { %1047 = vst [vmem:[%s1758_s19 + $0x40] sm:$0xff] %v1001_v47 }
 0x1b5   : > { %v1300_v48 = vpop.f32.mrb[10].mxu1 }
 0x1b6   : > { %v1016_v49 = vadd.f32 %v1326_v23, %v1300_v48  ;;  %v816_v50 = vpop.f32.mrb[11].mxu1 }
 0x1b7   : > { %v1011_v51 = vadd.f32 %v1010_v24, %v816_v50 }
 0x1b8   : > { %1050 = vst [vmem:[%s1758_s19 + $0x58] sm:$0xff] %v1016_v49 }
 0x1b9   : > { %1049 = vst [vmem:[%s1758_s19 + $0x50] sm:$0xff] %v1011_v51 }
 0x1c1   : > { %v1303_v52 = vpop.f32.mrb[12].mxu1 }
 0x1c2   : > { %v1026_v53 = vadd.f32 %v1329_v25, %v1303_v52  ;;  %v826_v54 = vpop.f32.mrb[13].mxu1 }
 0x1c3   : > { %v1021_v55 = vadd.f32 %v1020_v17, %v826_v54 }
 0x1c4   : > { %1052 = vst [vmem:[%s1758_s19 + $0x68] sm:$0xff] %v1026_v53 }
 0x1c5   : > { %1051 = vst [vmem:[%s1758_s19 + $0x60] sm:$0xff] %v1021_v55 }
 0x1cd   : > { %v1306_v56 = vpop.f32.mrb[14].mxu1 }
 0x1ce   : > { %v1036_v57 = vadd.f32 %v1332_v26, %v1306_v56  ;;  %v836_v58 = vpop.f32.mrb[15].mxu1 }
 0x1cf   : > { %v1031_v59 = vadd.f32 %v1030_v27, %v836_v58 }
 0x1d0   : > { %1054 = vst [vmem:[%s1758_s19 + $0x78] sm:$0xff] %v1036_v57 }
 0x1d1   : > { %1053 = vst [vmem:[%s1758_s19 + $0x70] sm:$0xff] %v1031_v59 }
 0x1d2   : > { %1415 = shalt.err (!%p1412_p3)
}
 0x1d3   : > { %s1416_s20 = scalar_lea.hbm %s1779_s14, 2048  ;;  %s1420_s13 = scalar_lea.hbm %s1834_s6, 4096 }
 0x1d4   : > { %p1417_p4 = scmp.ne.s32.totalorder %s1779_s14, %s1416_s20  ;;  %p1421_p9 = scmp.lt.u32.totalorder %s1779_s14, %s1834_s6 }
 0x1d5   : > { %p1422_p10 = scmp.lt.u32.totalorder %s1420_s13, %s1416_s20  ;;  %p1424_p12 = scmp.lt.u32.totalorder %s1416_s20, %s1779_s14 }
 0x1d6   : > { %p1418_p7 = pnand %p1417_p4, %p1544_p5 }
 0x1d7   : > { %p1423_p11 = por %p1422_p10, %p1421_p9 }
 0x1d8   : > { %p1419_p8 = pneg %p1418_p7 }
 0x1d9   : > { %p1425_p13 = por %p1424_p12, %p1423_p11 }
 0x1db   : > { %p1426_p0 = pnand %p1425_p13, %p1419_p8 }
 0x1dd   : > { %1429 = shalt.err (!%p1426_p0)
}
 0x1de   : > { %s1469_s28 = smov 128   ;;  %s1470_s11 = smov 8  }
 0x1df   : > { %1357 = dma.vmem_to_hbm [thread:$0]  (%p1544_p5), %s1781_s9, 2048, %s1779_s14, %s1787_s15, %s1469_s28, %s1469_s28, %s1470_s11  }
 0x1e0 PF: > { %p1363_p1 = scmp.ge.s32.totalorder %s1464_s24, 2  ;;  %s1084_s12 = sand.u32 1, %s1452_s21  }
 0x1e1   : > { %s1085_s25 = scalar_lea.sflag [#allocation3], %s1084_s12 }
 0x1e2   : > { %p1360_p2 = pnand %p1363_p1, %p1548_p6 }
 0x1e4   : > { %1447 = dma.done.wait (!%p1360_p2), %s1085_s25, 2048  }
 0x1e5   : > { %1449 = vsyncadd (!%p1360_p2), %s1085_s25, 4294965248  ;;  %p16_p3 = scmp.ge.s32.totalorder %s1531_s27, 4   ;;  %s1837_s21 = smov %s1456_s22 }
 0x1e6   : > { %s1838_s22 = smov %s1460_s23  ;;  %s1839_s23 = smov %s1542_s30 }
 0x1e7   : > { %s1840_s24 = smov %s1531_s27  ;;  %18 = sbr.rel (!%p16_p3) target bundleno = 3 (0x3), region = 88 }
 0x1ee   :  { %1090 = vsyncpa [#allocation3], 1 }
 0x1ef   :  { %1092 = vsyncpa [#allocation3 + $0x1], 1 }

</bundles_post_ra>
